<compile_context>
chip_gen: v6e
topology: v6e:2x2x1
jax: 0.10.0
libtpu: 0.0.40
codegen_flags: <defaults>
</compile_context>

<pallas_src>
import functools

import jax
import jax.numpy as jnp
from jax.experimental import pallas as pl
from jax.experimental.pallas import tpu as pltpu

EPS = 1e-5


# ---------------------------------------------------------------------------
# in-kernel helpers
# ---------------------------------------------------------------------------
def _partial_stats(y, rsel, i, P, TP):
    """Per-tile per-channel [sum, sum_sq] of y (TP, W*Cout) over VALID rows only.

    Routed through the MXU: a (1, TP) validity-mask row reduces over rows, then the
    (W*Cout, Cout) channel-folder matrix reduces the W positions per channel.
    """
    mrow = (jax.lax.broadcasted_iota(jnp.int32, (1, TP), 1) < (P - i * TP)
            ).astype(jnp.float32)
    s = jnp.dot(jnp.dot(mrow, y, preferred_element_type=jnp.float32), rsel,
                preferred_element_type=jnp.float32)                 # (1, Cout)
    sq = jnp.dot(jnp.dot(mrow, y * y, preferred_element_type=jnp.float32), rsel,
                 preferred_element_type=jnp.float32)                # (1, Cout)
    return s, sq


# ---------------------------------------------------------------------------
# kernels
# ---------------------------------------------------------------------------
def _conv1_res_kernel(x_ref, b1_ref, bd_mat_ref, bd_row_ref, rsel_ref,
                      y1_ref, res_ref, ssum_ref, ssq_ref, *, P, TP):
    i = pl.program_id(0)
    x = x_ref[...]                                                  # (TP, W*Cin) bf16
    # conv1 as ONE dense MXU matmul against the banded weight matrix.
    y = jnp.dot(x, b1_ref[...], preferred_element_type=jnp.float32)  # (TP, W*Cout) f32
    # NOTE: conv1 bias omitted - exactly cancelled by BN1's batch-mean subtraction.
    s, sq = _partial_stats(y, rsel_ref[...], i, P, TP)              # f32, pre-bf16-cast
    ssum_ref[...] = s[None]
    ssq_ref[...] = sq[None]
    y1_ref[...] = y.astype(y1_ref.dtype)                            # bf16 intermediate
    # fused residual path: 1x1 downsample (block-diagonal matrix) + bias.
    res = jnp.dot(x, bd_mat_ref[...], preferred_element_type=jnp.float32) + bd_row_ref[...]
    res_ref[...] = res.astype(res_ref.dtype)


def _bn1_relu_conv2_kernel(y1_ref, sc_ref, sh_ref, b2_ref, rsel_ref,
                           y2_ref, ssum_ref, ssq_ref, *, P, TP):
    i = pl.program_id(0)
    h1 = jnp.maximum(y1_ref[...].astype(jnp.float32) * sc_ref[...] + sh_ref[...], 0.0)
    # TODO(synk): dropout1 is stochastic in train mode; identity (eval semantics) here.
    y = jnp.dot(h1.astype(jnp.bfloat16), b2_ref[...],
                preferred_element_type=jnp.float32)                 # (TP, W*Cout) f32
    # conv2 bias omitted (cancelled by BN2), same as conv1.
    s, sq = _partial_stats(y, rsel_ref[...], i, P, TP)
    ssum_ref[...] = s[None]
    ssq_ref[...] = sq[None]
    y2_ref[...] = y.astype(y2_ref.dtype)


def _bn2_residual_kernel(y2_ref, res_ref, sc_ref, sh_ref, o_ref):
    h2 = y2_ref[...].astype(jnp.float32) * sc_ref[...] + sh_ref[...]
    # TODO(synk): dropout2 is stochastic in train mode; identity (eval semantics) here.
    o_ref[...] = jnp.maximum(h2 + res_ref[...].astype(jnp.float32), 0.0)


# ---------------------------------------------------------------------------
# wrapper-side helpers (plain JAX glue)
# ---------------------------------------------------------------------------
def _affine_rows(ssum, ssq, count, gamma, beta, W, eps=EPS):
    """Fold per-tile [sum, sum_sq] into BN scale/shift, tiled into (1, W*Cout) lane rows."""
    s = jnp.sum(ssum, axis=0).reshape(-1)
    sq = jnp.sum(ssq, axis=0).reshape(-1)
    mean = s / count
    var = sq / count - mean * mean        # biased variance (train-mode BN normalization)
    scale = gamma.reshape(-1) * jax.lax.rsqrt(var + eps)
    shift = beta.reshape(-1) - mean * scale
    C = scale.shape[0]
    return (jnp.tile(scale, W).reshape(1, W * C).astype(jnp.float32),
            jnp.tile(shift, W).reshape(1, W * C).astype(jnp.float32))


def _vmem_cap_bytes():
    """v5e / v6e have 128 MiB VMEM per core; v7x only 64 MiB - cap conservatively."""
    try:
        kind = jax.devices()[0].device_kind.lower()
    except Exception:
        kind = ""
    if ("v5" in kind) or ("v6" in kind):
        return 96 << 20
    return 48 << 20


def _choose_tile_rows(P, W, Cin, Cout, budget_bytes=24 << 20):
    """Largest 8-aligned (256-aligned when big) row tile within a live-data budget.

    P is padded UP to a multiple of the tile (never shrink the tile to an exact divisor).
    """
    per_row = 2 * W * (Cin + 3 * Cout) + 12 * W * Cout   # bf16 streamed + f32 temporaries
    tp = budget_bytes // (2 * max(per_row, 1))            # /2: double-buffered pipeline
    tp = max(8, (tp // 8) * 8)
    if tp >= 256:                                         # MXU M-dim alignment (v6e/v7x)
        tp = (tp // 256) * 256
    return int(min(tp, max(8, (-(-P // 8)) * 8)))


def temporal_block_forward(x_nchw, params, kernel_size, dilation, tile_rows=None):
    N, Cin, H, W = x_nchw.shape
    K, dil = kernel_size, dilation
    pad = ((K - 1) * dil) // 2
    Cout = params['w1'].shape[2]
    P = N * H
    count = float(P * W)
    Li, Lo = W * Cin, W * Cout

    TP = int(tile_rows) if tile_rows is not None else _choose_tile_rows(P, W, Cin, Cout)
    TP = max(8, (TP // 8) * 8)
    G = -(-P // TP)
    Ppad = G * TP

    # ---- glue: NCHW -> lane-dense (P, W*Cin) slab (w-major, channel-minor lanes) ----
    x = jnp.transpose(x_nchw, (0, 2, 3, 1)).reshape(P, Li)
    if Ppad != P:
        x = jnp.pad(x, ((0, Ppad - P), (0, 0)))           # pad rows excluded from BN stats
    x = x.astype(jnp.bfloat16)

    # ---- fold the dilated conv taps into banded weight matrices (conv == one matmul) ----
    eyes = [jnp.eye(W, k=-(t * dil - pad), dtype=jnp.float32) for t in range(K)]
    B1 = sum(jnp.kron(e, params['w1'][t].astype(jnp.float32)) for t, e in enumerate(eyes))
    B2 = sum(jnp.kron(e, params['w2'][t].astype(jnp.float32)) for t, e in enumerate(eyes))
    BD = jnp.kron(jnp.eye(W, dtype=jnp.float32), params['wd'].astype(jnp.float32))
    B1 = B1.astype(jnp.bfloat16)                           # (W*Cin,  W*Cout)
    B2 = B2.astype(jnp.bfloat16)                           # (W*Cout, W*Cout)
    BD = BD.astype(jnp.bfloat16)                           # (W*Cin,  W*Cout) block-diag
    bd_row = jnp.tile(params['bd'].reshape(-1), W).reshape(1, Lo).astype(jnp.float32)
    rsel = jnp.tile(jnp.eye(Cout, dtype=jnp.float32), (W, 1))   # (W*Cout, Cout) folder

    # ---- VMEM limit: 2x streamed blocks + weights + f32 temporaries (+ margin) ----
    blk = 2 * TP * (Li + 3 * Lo) + 4 * TP * Lo
    wts = 2 * (2 * Li * Lo + Lo * Lo) + 4 * (Lo * Cout + 3 * Lo)
    tmp = 12 * TP * Lo
    vmem_bytes = int(min(_vmem_cap_bytes(),
                         max(16 << 20, 2 * blk + wts + tmp + (2 << 20))))
    cp = pltpu.CompilerParams(dimension_semantics=("parallel",),
                              vmem_limit_bytes=vmem_bytes)

    row = lambda c: pl.BlockSpec((TP, c), lambda i: (i, 0))       # streamed row tile
    const = lambda r, c: pl.BlockSpec((r, c), lambda i: (0, 0))   # resident constant
    stat = pl.BlockSpec((1, 1, Cout), lambda i: (i, 0, 0))

    # ---- call 1: conv1 + fused 1x1 downsample residual + partial BN1 stats ----
    y1, res, ss1, sq1 = pl.pallas_call(
        functools.partial(_conv1_res_kernel, P=P, TP=TP),
        grid=(G,),
        in_specs=[row(Li), const(Li, Lo), const(Li, Lo), const(1, Lo), const(Lo, Cout)],
        out_specs=[row(Lo), row(Lo), stat, stat],
        out_shape=[jax.ShapeDtypeStruct((Ppad, Lo), jnp.bfloat16),
                   jax.ShapeDtypeStruct((Ppad, Lo), jnp.bfloat16),
                   jax.ShapeDtypeStruct((G, 1, Cout), jnp.float32),
                   jax.ShapeDtypeStruct((G, 1, Cout), jnp.float32)],
        compiler_params=cp,
    )(x, B1, BD, bd_row, rsel)

    sc1, sh1 = _affine_rows(ss1, sq1, count, params['g1'], params['be1'], W)

    # ---- call 2: BN1 affine + ReLU + conv2 + partial BN2 stats ----
    y2, ss2, sq2 = pl.pallas_call(
        functools.partial(_bn1_relu_conv2_kernel, P=P, TP=TP),
        grid=(G,),
        in_specs=[row(Lo), const(1, Lo), const(1, Lo), const(Lo, Lo), const(Lo, Cout)],
        out_specs=[row(Lo), stat, stat],
        out_shape=[jax.ShapeDtypeStruct((Ppad, Lo), jnp.bfloat16),
                   jax.ShapeDtypeStruct((G, 1, Cout), jnp.float32),
                   jax.ShapeDtypeStruct((G, 1, Cout), jnp.float32)],
        compiler_params=cp,
    )(y1, sc1, sh1, B2, rsel)

    sc2, sh2 = _affine_rows(ss2, sq2, count, params['g2'], params['be2'], W)

    # ---- call 3: BN2 affine + residual add + final ReLU ----
    out = pl.pallas_call(
        _bn2_residual_kernel,
        grid=(G,),
        in_specs=[row(Lo), row(Lo), const(1, Lo), const(1, Lo)],
        out_specs=row(Lo),
        out_shape=jax.ShapeDtypeStruct((Ppad, Lo), jnp.float32),
        compiler_params=cp,
    )(y2, res, sc2, sh2)

    # glue: (P, W*Cout) slab -> NCHW
    out = out[:P].reshape(N, H, W, Cout)
    return jnp.transpose(out, (0, 3, 1, 2))


# ---------------- pure-JAX reference (fp32, for correctness check) ----------------
def ref_forward(x, params, K, dil, eps=EPS):
    pad = ((K - 1) * dil) // 2

    def conv(inp, w_kio, b):
        w = jnp.transpose(w_kio, (2, 1, 0))[:, :, None, :]  # (Cout, Cin, 1, K)
        y = jax.lax.conv_general_dilated(
            inp, w, window_strides=(1, 1), padding=((0, 0), (pad, pad)),
            rhs_dilation=(1, dil), dimension_numbers=('NCHW', 'OIHW', 'NCHW'))
        return y + b.reshape(1, -1, 1, 1)

    def bn(y, g, beta):
        m = jnp.mean(y, axis=(0, 2, 3), keepdims=True)
        v = jnp.mean((y - m) ** 2, axis=(0, 2, 3), keepdims=True)
        return g.reshape(1, -1, 1, 1) * (y - m) * jax.lax.rsqrt(v + eps) + beta.reshape(1, -1, 1, 1)

    h1 = jax.nn.relu(bn(conv(x, params['w1'], params['b1']), params['g1'], params['be1']))
    h2 = bn(conv(h1, params['w2'], params['b2']), params['g2'], params['be2'])
    wd = jnp.transpose(params['wd'], (1, 0))[:, :, None, None]  # (Cout, Cin, 1, 1)
    res = jax.lax.conv_general_dilated(
        x, wd, window_strides=(1, 1), padding=((0, 0), (0, 0)),
        dimension_numbers=('NCHW', 'OIHW', 'NCHW')) + params['bd'].reshape(1, -1, 1, 1)
    return jax.nn.relu(h2 + res)


if __name__ == "__main__":
    # n_inputs=4, n_outputs=8, kernel_size=3, stride=1, dilation=2 -> same_padding=2.
    N, Cin, Cout, H, W = 2, 4, 8, 16, 16
    K, dil = 3, 2

    key = jax.random.PRNGKey(0)
    ks = jax.random.split(key, 8)

    def kaiming(k, shape, fan_in):
        return jax.random.normal(k, shape, jnp.float32) * jnp.sqrt(2.0 / fan_in)

    def bias_init(k, cout, fan_in):
        bound = 1.0 / float(fan_in) ** 0.5
        return jax.random.uniform(k, (1, 1, cout), jnp.float32, -bound, bound)

    params = {
        # conv1 weight, stored as (K, Cin, Cout)  (PyTorch: (Cout, Cin, 1, K))
        'w1': kaiming(ks[0], (K, Cin, Cout), Cin * K),
        'b1': bias_init(ks[1], Cout, Cin * K),   # reference only (cancelled by train-mode BN)
        'g1': jnp.ones((1, 1, Cout), jnp.float32),
        'be1': jnp.zeros((1, 1, Cout), jnp.float32),
        'w2': kaiming(ks[2], (K, Cout, Cout), Cout * K),
        'b2': bias_init(ks[3], Cout, Cout * K),  # reference only
        'g2': jnp.ones((1, 1, Cout), jnp.float32),
        'be2': jnp.zeros((1, 1, Cout), jnp.float32),
        # downsample 1x1 conv (n_inputs != n_outputs), stored as (Cin, Cout)
        'wd': kaiming(ks[4], (Cin, Cout), Cin),
        'bd': bias_init(ks[5], Cout, Cin),
    }

    x = jax.random.normal(ks[6], (N, Cin, H, W), jnp.float32)

    # tile_rows=8 -> 4 row-tiles, exercising the tiled / partial-stats path.
    out = temporal_block_forward(x, params, K, dil, tile_rows=8)
    out = jax.block_until_ready(out)
    assert out.shape == (N, Cout, H, W)

    ref = ref_forward(x, params, K, dil)
    err = float(jnp.max(jnp.abs(out - ref)))
    # bf16 matmul operands / intermediates with f32 accumulation -> relaxed tolerance.
    assert jnp.allclose(out, ref, atol=4e-2, rtol=4e-2), f"max abs err {err}"

    # ragged N*H (not a multiple of the row tile): exercises P padding + masked BN stats.
    x2 = jax.random.normal(ks[7], (N, Cin, 5, W), jnp.float32)
    out2 = jax.block_until_ready(temporal_block_forward(x2, params, K, dil, tile_rows=8))
    ref2 = ref_forward(x2, params, K, dil)
    err2 = float(jnp.max(jnp.abs(out2 - ref2)))
    assert jnp.allclose(out2, ref2, atol=4e-2, rtol=4e-2), f"max abs err {err2}"

    print("KERNEL_OK")
</pallas_src>

<mosaic_0001>
module attributes {stable_mosaic.version = 11 : i64} {
  func.func @_conv1_res_kernel(%arg0: i32, %arg1: memref<8x64xbf16, #tpu.memory_space<vmem>>, %arg2: memref<64x128xbf16, #tpu.memory_space<vmem>>, %arg3: memref<64x128xbf16, #tpu.memory_space<vmem>>, %arg4: memref<1x128xf32, #tpu.memory_space<vmem>>, %arg5: memref<128x8xf32, #tpu.memory_space<vmem>>, %arg6: memref<8x128xbf16, #tpu.memory_space<vmem>>, %arg7: memref<8x128xbf16, #tpu.memory_space<vmem>>, %arg8: memref<1x1x8xf32, #tpu.memory_space<vmem>>, %arg9: memref<1x1x8xf32, #tpu.memory_space<vmem>>) attributes {dimension_semantics = [#tpu.dimension_semantics<parallel>], iteration_bounds = array<i64: 4>, scalar_prefetch = 0 : i64, scratch_operands = 0 : i64, tpu.core_type = #tpu.core_type<tc>, window_params = [{transform_indices = @transform_0, window_bounds = array<i64: 8, 64>}, {pipeline_mode = #tpu.pipeline_mode<synchronous>, transform_indices = @transform_1, window_bounds = array<i64: 64, 128>}, {pipeline_mode = #tpu.pipeline_mode<synchronous>, transform_indices = @transform_2, window_bounds = array<i64: 64, 128>}, {pipeline_mode = #tpu.pipeline_mode<synchronous>, transform_indices = @transform_3, window_bounds = array<i64: 1, 128>}, {pipeline_mode = #tpu.pipeline_mode<synchronous>, transform_indices = @transform_4, window_bounds = array<i64: 128, 8>}, {transform_indices = @transform_5, window_bounds = array<i64: 8, 128>}, {transform_indices = @transform_6, window_bounds = array<i64: 8, 128>}, {transform_indices = @transform_7, window_bounds = array<i64: 1, 1, 8>}, {transform_indices = @transform_8, window_bounds = array<i64: 1, 1, 8>}]} {
    %c0 = arith.constant 0 : index
    %c0_0 = arith.constant 0 : index
    %0 = vector.load %arg1[%c0, %c0_0] : memref<8x64xbf16, #tpu.memory_space<vmem>>, vector<8x64xbf16>
    %c0_1 = arith.constant 0 : index
    %c0_2 = arith.constant 0 : index
    %1 = vector.load %arg2[%c0_1, %c0_2] : memref<64x128xbf16, #tpu.memory_space<vmem>>, vector<64x128xbf16>
    %cst = arith.constant dense<0.000000e+00> : vector<8x128xf32>
    %2 = tpu.matmul %0, %1, %cst {dimension_numbers = #tpu.dot_dimension_numbers<[1], [0], [0], [1], [0, 0, 1, 1], [], []>} : vector<8x64xbf16>, vector<64x128xbf16>, vector<8x128xf32> -> vector<8x128xf32>
    %c0_3 = arith.constant 0 : index
    %c0_4 = arith.constant 0 : index
    %3 = vector.load %arg5[%c0_3, %c0_4] : memref<128x8xf32, #tpu.memory_space<vmem>>, vector<128x8xf32>
    %4 = tpu.iota {dimensions = array<i32: 1>} : vector<1x8xi32>
    %c8_i32 = arith.constant 8 : i32
    %5 = arith.muli %arg0, %c8_i32 : i32
    %c32_i32 = arith.constant 32 : i32
    %6 = arith.subi %c32_i32, %5 : i32
    %7 = vector.broadcast %6 : i32 to vector<1x8xi32>
    %8 = arith.cmpi slt, %4, %7 : vector<1x8xi32>
    %9 = arith.extui %8 : vector<1x8xi1> to vector<1x8xi32>
    %10 = arith.sitofp %9 : vector<1x8xi32> to vector<1x8xf32>
    %cst_5 = arith.constant dense<0.000000e+00> : vector<1x128xf32>
    %11 = tpu.matmul %10, %2, %cst_5 {dimension_numbers = #tpu.dot_dimension_numbers<[1], [0], [0], [1], [0, 0, 1, 1], [], []>} : vector<1x8xf32>, vector<8x128xf32>, vector<1x128xf32> -> vector<1x128xf32>
    %cst_6 = arith.constant dense<0.000000e+00> : vector<1x8xf32>
    %12 = tpu.matmul %11, %3, %cst_6 {dimension_numbers = #tpu.dot_dimension_numbers<[1], [0], [0], [1], [0, 0, 1, 1], [], []>} : vector<1x128xf32>, vector<128x8xf32>, vector<1x8xf32> -> vector<1x8xf32>
    %13 = arith.mulf %2, %2 : vector<8x128xf32>
    %cst_7 = arith.constant dense<0.000000e+00> : vector<1x128xf32>
    %14 = tpu.matmul %10, %13, %cst_7 {dimension_numbers = #tpu.dot_dimension_numbers<[1], [0], [0], [1], [0, 0, 1, 1], [], []>} : vector<1x8xf32>, vector<8x128xf32>, vector<1x128xf32> -> vector<1x128xf32>
    %cst_8 = arith.constant dense<0.000000e+00> : vector<1x8xf32>
    %15 = tpu.matmul %14, %3, %cst_8 {dimension_numbers = #tpu.dot_dimension_numbers<[1], [0], [0], [1], [0, 0, 1, 1], [], []>} : vector<1x128xf32>, vector<128x8xf32>, vector<1x8xf32> -> vector<1x8xf32>
    %16 = vector.shape_cast %12 : vector<1x8xf32> to vector<1x1x8xf32>
    %c0_9 = arith.constant 0 : index
    %c0_10 = arith.constant 0 : index
    %c0_11 = arith.constant 0 : index
    %17 = vector.load %arg8[%c0_9, %c0_10, %c0_11] : memref<1x1x8xf32, #tpu.memory_space<vmem>>, vector<1x1x8xf32>
    tpu.vector_store %arg8[%c0_9, %c0_10, %c0_11], %16 {strides = array<i32>} : memref<1x1x8xf32, #tpu.memory_space<vmem>>, vector<1x1x8xf32>,
    %18 = vector.shape_cast %15 : vector<1x8xf32> to vector<1x1x8xf32>
    %c0_12 = arith.constant 0 : index
    %c0_13 = arith.constant 0 : index
    %c0_14 = arith.constant 0 : index
    %19 = vector.load %arg9[%c0_12, %c0_13, %c0_14] : memref<1x1x8xf32, #tpu.memory_space<vmem>>, vector<1x1x8xf32>
    tpu.vector_store %arg9[%c0_12, %c0_13, %c0_14], %18 {strides = array<i32>} : memref<1x1x8xf32, #tpu.memory_space<vmem>>, vector<1x1x8xf32>,
    %20 = arith.truncf %2 : vector<8x128xf32> to vector<8x128xbf16>
    %c0_15 = arith.constant 0 : index
    %c0_16 = arith.constant 0 : index
    %21 = vector.load %arg6[%c0_15, %c0_16] : memref<8x128xbf16, #tpu.memory_space<vmem>>, vector<8x128xbf16>
    tpu.vector_store %arg6[%c0_15, %c0_16], %20 {strides = array<i32>} : memref<8x128xbf16, #tpu.memory_space<vmem>>, vector<8x128xbf16>,
    %c0_17 = arith.constant 0 : index
    %c0_18 = arith.constant 0 : index
    %22 = vector.load %arg3[%c0_17, %c0_18] : memref<64x128xbf16, #tpu.memory_space<vmem>>, vector<64x128xbf16>
    %cst_19 = arith.constant dense<0.000000e+00> : vector<8x128xf32>
    %23 = tpu.matmul %0, %22, %cst_19 {dimension_numbers = #tpu.dot_dimension_numbers<[1], [0], [0], [1], [0, 0, 1, 1], [], []>} : vector<8x64xbf16>, vector<64x128xbf16>, vector<8x128xf32> -> vector<8x128xf32>
    %c0_20 = arith.constant 0 : index
    %c0_21 = arith.constant 0 : index
    %24 = vector.load %arg4[%c0_20, %c0_21] : memref<1x128xf32, #tpu.memory_space<vmem>>, vector<1x128xf32>
    %25 = vector.broadcast %24 : vector<1x128xf32> to vector<8x128xf32>
    %26 = arith.addf %23, %25 : vector<8x128xf32>
    %27 = arith.truncf %26 : vector<8x128xf32> to vector<8x128xbf16>
    %c0_22 = arith.constant 0 : index
    %c0_23 = arith.constant 0 : index
    %28 = vector.load %arg7[%c0_22, %c0_23] : memref<8x128xbf16, #tpu.memory_space<vmem>>, vector<8x128xbf16>
    tpu.vector_store %arg7[%c0_22, %c0_23], %27 {strides = array<i32>} : memref<8x128xbf16, #tpu.memory_space<vmem>>, vector<8x128xbf16>,
    return
  }
  func.func @transform_0(%arg0: i32) -> (i32, i32) {
    %c0_i32 = arith.constant 0 : i32
    %c0_i32_0 = arith.constant 0 : i32
    return %arg0, %c0_i32 : i32, i32
  }
  func.func @transform_1(%arg0: i32) -> (i32, i32) {
    %c0_i32 = arith.constant 0 : i32
    %c0_i32_0 = arith.constant 0 : i32
    %c0_i32_1 = arith.constant 0 : i32
    return %c0_i32, %c0_i32_0 : i32, i32
  }
  func.func @transform_2(%arg0: i32) -> (i32, i32) {
    %c0_i32 = arith.constant 0 : i32
    %c0_i32_0 = arith.constant 0 : i32
    %c0_i32_1 = arith.constant 0 : i32
    return %c0_i32, %c0_i32_0 : i32, i32
  }
  func.func @transform_3(%arg0: i32) -> (i32, i32) {
    %c0_i32 = arith.constant 0 : i32
    %c0_i32_0 = arith.constant 0 : i32
    %c0_i32_1 = arith.constant 0 : i32
    return %c0_i32, %c0_i32_0 : i32, i32
  }
  func.func @transform_4(%arg0: i32) -> (i32, i32) {
    %c0_i32 = arith.constant 0 : i32
    %c0_i32_0 = arith.constant 0 : i32
    %c0_i32_1 = arith.constant 0 : i32
    return %c0_i32, %c0_i32_0 : i32, i32
  }
  func.func @transform_5(%arg0: i32) -> (i32, i32) {
    %c0_i32 = arith.constant 0 : i32
    %c0_i32_0 = arith.constant 0 : i32
    return %arg0, %c0_i32 : i32, i32
  }
  func.func @transform_6(%arg0: i32) -> (i32, i32) {
    %c0_i32 = arith.constant 0 : i32
    %c0_i32_0 = arith.constant 0 : i32
    return %arg0, %c0_i32 : i32, i32
  }
  func.func @transform_7(%arg0: i32) -> (i32, i32, i32) {
    %c0_i32 = arith.constant 0 : i32
    %c0_i32_0 = arith.constant 0 : i32
    %c0_i32_1 = arith.constant 0 : i32
    return %arg0, %c0_i32, %c0_i32_0 : i32, i32, i32
  }
  func.func @transform_8(%arg0: i32) -> (i32, i32, i32) {
    %c0_i32 = arith.constant 0 : i32
    %c0_i32_0 = arith.constant 0 : i32
    %c0_i32_1 = arith.constant 0 : i32
    return %arg0, %c0_i32, %c0_i32_0 : i32, i32, i32
  }
}

</mosaic_0001>

<bundles_post_ra>
// kernel: tpu_custom_call.1
= control target key start
LH: loop header
LB: loop body
LE: loop exit
PB: predicated region body
PF: predicated region fallthrough
CT: control target
= control target key end

     0   :  { %s1797_s0 = inlined_call_operand.vmem [shape: bf16[32,64], index: 0, kind: input, shape index: {}]   ;;  %s1798_s1 = inlined_call_operand.vmem [shape: bf16[64,128], index: 1, kind: input, shape index: {}]   ;;  %s1799_s2 = inlined_call_operand.vmem [shape: bf16[64,128], index: 2, kind: input, shape index: {}]   ;;  %s1800_s3 = inlined_call_operand.vmem [shape: f32[1,128], index: 3, kind: input, shape index: {}]   ;;  %s1801_s4 = inlined_call_operand.vmem [shape: f32[128,8], index: 4, kind: input, shape index: {}]   ;;  %s1802_s5 = inlined_call_operand.hbm [shape: bf16[32,128], index: 5, kind: output, shape index: {0}]   ;;  %s1803_s6 = inlined_call_operand.hbm [shape: bf16[32,128], index: 6, kind: output, shape index: {1}]   ;;  %s1804_s7 = inlined_call_operand.hbm [shape: f32[4,1,8], index: 7, kind: output, shape index: {2}]   ;;  %s1805_s8 = inlined_call_operand.hbm [shape: f32[4,1,8], index: 8, kind: output, shape index: {3}]  }
   0x1   :  { %1810 = sst [smem:[#allocation12_spill]] %s1797_s0 }
   0x2   :  { %1811 = sst [smem:[#allocation13_spill]] %s1798_s1 }
   0x3   :  { %14 = vsyncpa [#allocation3], 0 }
   0x4   :  { %16 = vsyncpa [#allocation3 + $0x1], 0 }
   0x5   :  { %17 = vsyncpa [#allocation5], 0 }
   0x6   :  { %19 = vsyncpa [#allocation5 + $0x1], 0 }
   0x7   :  { %20 = vsyncpa [#allocation8], 0 }
   0x8   :  { %22 = vsyncpa [#allocation8 + $0x1], 0  ;;  %s1455_s27 = smov 0   ;;  %s1457_s28 = smov 0  }
   0x9   :  { %s1459_s29 = smov 0   ;;  %s1461_s30 = smov 0  }
   0xa LB: > { %s1476_s9 = sadd.s32 4294967295, %s1402_s30   ;;  %s1806_s10 = sadd.s32 4294967294, %s1402_s30   ;;  %s1402_s30 = sphi %s1461_s30, %s1823_s30   ;;  %s1398_s29 = sphi %s1459_s29, %s1822_s29   ;;  %s1394_s28 = sphi %s1457_s28, %s1821_s28   ;;  %s1390_s27 = sphi %s1455_s27, %s1820_s27  }
   0xb   : > { %s1480_s11 = sadd.s32 1, %s1402_s30   ;;  %s145_s12 = sadd.s32 1, %s1398_s29 }
   0xc   : > { %s142_s13 = ssub.s32 %s1402_s30, %s1480_s11  ;;  %p155_p0 = scmp.ne.s32.totalorder %s1398_s29, %s1394_s28 }
   0xd   : > { %p143_p1 = scmp.eq.s32.totalorder %s142_s13, 0  ;;  %p156_p2 = scmp.eq.s32.totalorder %s1476_s9, 3 }
   0xe   : > { %p161_p3 = scmp.ne.s32.totalorder %s1394_s28, %s1390_s27  ;;  %p162_p4 = scmp.eq.s32.totalorder %s1806_s10, 3 }
   0xf   : > { %s1493_s14 = scalar_select %p143_p1, %s1398_s29, %s145_s12  }
  0x10   : > { %p1495_p5 = por %p156_p2, %p155_p0  ;;  %p1499_p6 = por %p162_p4, %p161_p3 }
  0x11   : > { %p1013_p7 = scmp.ge.s32.totalorder %s1402_s30, 1  ;;  %p277_p8 = scmp.lt.s32.totalorder %s1402_s30, 5 }
  0x13   : > { %p278_p9 = pnand %p1013_p7, %p277_p8 }
  0x14   : > { %s1814_s1 = sld [smem:[#allocation13_spill]] (!%p278_p9)  ;;  %p323_p10 = scmp.lt.s32.totalorder (!%p278_p9), %s1476_s9, 3 }
  0x15   : > { %281 = sbr.rel (%p278_p9) target bundleno = 686 (0x2ae), region = 40  ;;  %s1815_s0 = sld [smem:[#allocation12_spill]] (!%p278_p9) }
  0x16   : > { %s1022_s18 = sshll.u32 (!%p278_p9), %s1476_s9, 3  ;;  %s1540_s20 = sand.u32 (!%p278_p9), 1, %s1394_s28  }
  0x17   : > { %s424_s19 = ssub.s32 (!%p278_p9), 32, %s1022_s18  ;;  %s1808_s12 = sshll.u32 (!%p278_p9), %s1476_s9, 6 }
  0x18   : > { %s825_s18 = scalar_lea.hbm (!%p278_p9), %s1802_s5, %s1808_s12  ;;  %s801_s22 = scalar_lea.sflag (!%p278_p9), [#allocation3], %s1540_s20 }
  0x1a   : > { %v1248_v0 = vld [vmem:[%s1814_s1 + $0x18] sm:$0xff]   ;;  %v1404_v1 = vmov 0.0   ;;  %v1249_v2 = vld [vmem:[%s1814_s1 + $0x10] sm:$0xff]   ;;  %vm1405_vm0 = vmmov 0   ;;  %s324_s21 = scalar_select %p323_p10, %s1476_s9, 3  ;;  %v1250_v3 = vld [vmem:[%s1814_s1 + $0x8] sm:$0xff]   ;;  %v421_v6 = vlaneseq  ;;  %v425_v8 = vstv %s424_s19 }
  0x1b   : > { %1088 = vmatprep.subr.bf16.mxu0 %v1404_v1  ;;  %1100 = vmatprep.subr.mxu1 %v1404_v1  ;;  %v1251_v4 = vld [vmem:[%s1814_s1] sm:$0xff]   ;;  %vm361_vm1 = vcmask 523264   ;;  %vm429_vm3 = vcmask 64512   ;;  %v420_v11 = vld [vmem:[%s1801_s4 + $0x78] sm:$0xff]  ;;  %v419_v15 = vld [vmem:[%s1801_s4 + $0x70] sm:$0xff] }
  0x1c   : > { %1089 = vmatpush3.bf16.msra.mxu0 %v1248_v0  ;;  %1096 = vmatprep.mubr.msk.bf16.mxu0 %vm1405_vm0, %v1404_v1  ;;  %s1016_s24 = sshll.u32 %s324_s21, 2  ;;  %v422_v7 = vand.u32 127, %v421_v6  ;;  %s1807_s21 = sshll.u32 %s1540_s20, 2  ;;  %v418_v17 = vld [vmem:[%s1801_s4 + $0x68] sm:$0xff]  ;;  %v417_v19 = vld [vmem:[%s1801_s4 + $0x60] sm:$0xff]  ;;  %v416_v20 = vld [vmem:[%s1801_s4 + $0x58] sm:$0xff] }
  0x1d   : > { %1090 = vmatprep.subr.bf16.mxu0 %v1404_v1  ;;  %1102 = vmatprep.mubr.msk.f32.mxu1 %vm1405_vm0, %v1404_v1  ;;  %s326_s17 = scalar_lea.vmem %s1815_s0, %s1016_s24  ;;  %s1553_s26 = scalar_lea.vmem [#allocation2], %s1807_s21  ;;  %v415_v21 = vld [vmem:[%s1801_s4 + $0x50] sm:$0xff]  ;;  %v414_v22 = vld [vmem:[%s1801_s4 + $0x48] sm:$0xff]  ;;  %v413_v23 = vld [vmem:[%s1801_s4 + $0x40] sm:$0xff] }
  0x1e   : > { %v1531_v5 = vld [vmem:[%s326_s17] sm:$0xf]  ;;  %vm426_vm2 = vcmp.lt.s32.totalorder %v422_v7, %v425_v8  ;;  %v412_v24 = vld [vmem:[%s1801_s4 + $0x38] sm:$0xff]  ;;  %v411_v25 = vld [vmem:[%s1801_s4 + $0x30] sm:$0xff]  ;;  %s827_s19 = sshll.u32 %s1553_s26, 4  ;;  %s1406_s24 = smov [#allocation2]   ;;  %s828_s19 = int_to_ptr.vmem [resolvable:$true] %s827_s19 }
  0x1f   : > { %v1023_v9 = vsel %vm426_vm2, 1.0, %v1404_v1  ;;  %v410_v26 = vld [vmem:[%s1801_s4 + $0x28] sm:$0xff]  ;;  %v409_v27 = vld [vmem:[%s1801_s4 + $0x20] sm:$0xff]  ;;  %v408_v28 = vld [vmem:[%s1801_s4 + $0x18] sm:$0xff]  ;;  %s1256_s23 = scalar_lea.vmem %s828_s19, 64  ;;  %s1260_s25 = sshll.u32 %s1406_s24, 4  ;;  %s1261_s25 = int_to_ptr.vmem [resolvable:$false] %s1260_s25 }
  0x20   : > { %1091 = vmatpush3.bf16.msra.mxu0 %v1249_v2  ;;  %v407_v29 = vld [vmem:[%s1801_s4 + $0x10] sm:$0xff]  ;;  %v406_v30 = vld [vmem:[%s1801_s4 + $0x8] sm:$0xff]  ;;  %v405_v31 = vld [vmem:[%s1801_s4] sm:$0xff]  ;;  %p1257_p11 = scmp.ne.s32.totalorder %s828_s19, %s1256_s23  ;;  %s1262_s10 = scalar_lea.vmem %s1261_s25, 128 }
  0x21   : > { %1092 = vmatprep.subr.bf16.mxu0 %v1404_v1  ;;  %v1252_v32 = vld [vmem:[%s1799_s2 + $0x18] sm:$0xff]   ;;  %v1253_v35 = vld [vmem:[%s1799_s2 + $0x10] sm:$0xff]   ;;  %v1254_v38 = vld [vmem:[%s1799_s2 + $0x8] sm:$0xff]   ;;  %p1263_p0 = scmp.lt.s32.totalorder %s828_s19, %s1261_s25  ;;  %p1264_p1 = scmp.lt.s32.totalorder %s1262_s10, %s1256_s23 }
  0x22   : > { %v1255_v39 = vld [vmem:[%s1799_s2] sm:$0xff]   ;;  %p1258_p12 = pnand %p1257_p11, %p1495_p5 }
  0x23   : > { %p1265_p2 = por %p1264_p1, %p1263_p0 }
  0x24   : > { %1093 = vmatpush3.bf16.msra.mxu0 %v1250_v3  ;;  %p1259_p13 = pneg %p1258_p12 }
  0x25   : > { %1094 = vmatprep.subr.bf16.mxu0 %v1404_v1 }
  0x26   : > { %p1266_p3 = pnand %p1265_p2, %p1259_p13 }
  0x28   : > { %1095 = vmatpush3.bf16.msra.mxu0 %v1251_v4 }
  0x29   : > { %1140 = vmatprep.subr.mxu0 %v1404_v1 }
  0x2b   : > { %1097 = vmatmul.mubr.msk.bf16.vlgmr.msra.gmra.mxu0 %vm361_vm1, %v1531_v5 }
  0x2c   : > { %1142 = vmatprep.mubr.msk.f32.mxu0 %vm1405_vm0, %v1404_v1 }
  0xeb   : > { %v399_v10 = vpop.f32.mrf.mxu0 }
  0xec   : > { %v573_v12 = vmul.f32 %v399_v10, %v399_v10  ;;  %v717_v13 = vpack.c.bf16 %v399_v10, %v399_v10  ;;  %1101 = vmatpush3.msra.mxu1 %v399_v10 }
  0xed   : > { %v1098_v14 = vpop.f32.mrf.mxu0  ;;  %1103 = vmatmul.mubr.msk.f32.vlgmr.msra.gmra.mxu1 %vm429_vm3, %v1023_v9  ;;  %1105 = vmatprep.subr.mxu1 %v1404_v1 }
  0xee   : > { %1141 = vmatpush3.msra.mxu0 %v573_v12  ;;  %1106 = vmatpush3.msra.mxu1 %v420_v11  ;;  %718 = vst [vmem:[%s1553_s26] sm:$0xf] %v717_v13 }
  0xef   : > { %v402_v16 = vpop.f32.mrf.mxu0  ;;  %1143 = vmatmul.mubr.msk.f32.vlgmr.msra.gmra.mxu0 %vm429_vm3, %v1023_v9  ;;  %1107 = vmatprep.subr.mxu1 %v1404_v1 }
  0xf0   : > { %1108 = vmatpush3.msra.mxu1 %v419_v15  ;;  %1145 = vmatprep.subr.mxu0 %v1404_v1 }
  0xf1   : > { %v1099_v18 = vpop.f32.mrf.mxu0  ;;  %1109 = vmatprep.subr.mxu1 %v1404_v1  ;;  %1146 = vmatpush3.msra.mxu0 %v420_v11 }
  0xf2   : > { %1110 = vmatpush3.msra.mxu1 %v418_v17  ;;  %1147 = vmatprep.subr.mxu0 %v1404_v1 }
  0xf3   : > { %1111 = vmatprep.subr.mxu1 %v1404_v1  ;;  %1148 = vmatpush3.msra.mxu0 %v419_v15 }
  0xf4   : > { %1112 = vmatpush3.msra.mxu1 %v417_v19  ;;  %1149 = vmatprep.subr.mxu0 %v1404_v1 }
  0xf5   : > { %1113 = vmatprep.subr.mxu1 %v1404_v1  ;;  %1150 = vmatpush3.msra.mxu0 %v418_v17 }
  0xf6   : > { %1114 = vmatpush3.msra.mxu1 %v416_v20  ;;  %1151 = vmatprep.subr.mxu0 %v1404_v1 }
  0xf7   : > { %1115 = vmatprep.subr.mxu1 %v1404_v1  ;;  %1152 = vmatpush3.msra.mxu0 %v417_v19 }
  0xf8   : > { %1116 = vmatpush3.msra.mxu1 %v415_v21  ;;  %1153 = vmatprep.subr.mxu0 %v1404_v1 }
  0xf9   : > { %1117 = vmatprep.subr.mxu1 %v1404_v1  ;;  %1154 = vmatpush3.msra.mxu0 %v416_v20 }
  0xfa   : > { %1118 = vmatpush3.msra.mxu1 %v414_v22  ;;  %1155 = vmatprep.subr.mxu0 %v1404_v1 }
  0xfb   : > { %1119 = vmatprep.subr.mxu1 %v1404_v1  ;;  %1156 = vmatpush3.msra.mxu0 %v415_v21 }
  0xfc   : > { %1120 = vmatpush3.msra.mxu1 %v413_v23  ;;  %1157 = vmatprep.subr.mxu0 %v1404_v1 }
  0xfd   : > { %1121 = vmatprep.subr.mxu1 %v1404_v1  ;;  %1137 = vmatprep.mubr.msk.f32.mxu1 %vm1405_vm0, %v1404_v1 }
  0xfe   : > { %1122 = vmatpush3.msra.mxu1 %v412_v24  ;;  %1158 = vmatpush3.msra.mxu0 %v414_v22 }
  0xff   : > { %1123 = vmatprep.subr.mxu1 %v1404_v1  ;;  %1159 = vmatprep.subr.mxu0 %v1404_v1 }
 0x100   : > { %1124 = vmatpush3.msra.mxu1 %v411_v25  ;;  %1160 = vmatpush3.msra.mxu0 %v413_v23 }
 0x101   : > { %1125 = vmatprep.subr.mxu1 %v1404_v1  ;;  %1161 = vmatprep.subr.mxu0 %v1404_v1 }
 0x102   : > { %1126 = vmatpush3.msra.mxu1 %v410_v26  ;;  %1162 = vmatpush3.msra.mxu0 %v412_v24 }
 0x103   : > { %1127 = vmatprep.subr.mxu1 %v1404_v1  ;;  %1163 = vmatprep.subr.mxu0 %v1404_v1 }
 0x104   : > { %1128 = vmatpush3.msra.mxu1 %v409_v27  ;;  %1164 = vmatpush3.msra.mxu0 %v411_v25 }
 0x105   : > { %1129 = vmatprep.subr.mxu1 %v1404_v1  ;;  %1165 = vmatprep.subr.mxu0 %v1404_v1 }
 0x106   : > { %1130 = vmatpush3.msra.mxu1 %v408_v28  ;;  %1166 = vmatpush3.msra.mxu0 %v410_v26 }
 0x107   : > { %1131 = vmatprep.subr.mxu1 %v1404_v1  ;;  %1167 = vmatprep.subr.mxu0 %v1404_v1 }
 0x108   : > { %1132 = vmatpush3.msra.mxu1 %v407_v29  ;;  %1168 = vmatpush3.msra.mxu0 %v409_v27 }
 0x109   : > { %1133 = vmatprep.subr.mxu1 %v1404_v1  ;;  %1169 = vmatprep.subr.mxu0 %v1404_v1 }
 0x10a   : > { %1134 = vmatpush3.msra.mxu1 %v406_v30  ;;  %1170 = vmatpush3.msra.mxu0 %v408_v28 }
 0x10b   : > { %1135 = vmatprep.subr.mxu1 %v1404_v1  ;;  %1171 = vmatprep.subr.mxu0 %v1404_v1 }
 0x10c   : > { %1136 = vmatpush3.msra.mxu1 %v405_v31  ;;  %1172 = vmatpush3.msra.mxu0 %v407_v29 }
 0x10d   : > { %1180 = vmatprep.subr.bf16.mxu1 %v1404_v1  ;;  %1173 = vmatprep.subr.mxu0 %v1404_v1 }
 0x10e   : > { %1174 = vmatpush3.msra.mxu0 %v406_v30  ;;  %1177 = vmatprep.mubr.msk.f32.mxu0 %vm1405_vm0, %v1404_v1 }
 0x10f   : > { %1175 = vmatprep.subr.mxu0 %v1404_v1 }
 0x110   : > { %1176 = vmatpush3.msra.mxu0 %v405_v31 }
 0x1ad   : > { %v499_v33 = vpop.f32.mrf.mxu1 }
 0x1ae   : > { %1138 = vmatmul.mubr.f32.vlgmr.msra.gmra.mxu1 %v499_v33 }
 0x1af   : > { %1181 = vmatpush3.bf16.msra.mxu1 %v1252_v32  ;;  %v1104_v34 = vpop.f32.mrf.mxu1  ;;  %1188 = vmatprep.mubr.msk.bf16.mxu1 %vm1405_vm0, %v1404_v1  ;;  %v640_v36 = vpop.f32.mrf.mxu0 }
 0x1b0   : > { %1182 = vmatprep.subr.bf16.mxu1 %v1404_v1  ;;  %1178 = vmatmul.mubr.f32.vlgmr.msra.gmra.mxu0 %v640_v36 }
 0x1b1   : > { %v1144_v37 = vpop.f32.mrf.mxu0 }
 0x1b3   : > { %1183 = vmatpush3.bf16.msra.mxu1 %v1253_v35 }
 0x1b4   : > { %1184 = vmatprep.subr.bf16.mxu1 %v1404_v1 }
 0x1b7   : > { %1185 = vmatpush3.bf16.msra.mxu1 %v1254_v38 }
 0x1b8   : > { %1186 = vmatprep.subr.bf16.mxu1 %v1404_v1 }
 0x1bb   : > { %1187 = vmatpush3.bf16.msra.mxu1 %v1255_v39 }
 0x1be   : > { %1189 = vmatmul.mubr.msk.bf16.vlgmr.msra.gmra.mxu1 %vm361_vm1, %v1531_v5 }
 0x1bf   : > { %1269 = shalt.err (!%p1266_p3)
}
 0x1c0   : > { %s1270_s21 = scalar_lea.hbm %s825_s18, 64  ;;  %s1274_s17 = scalar_lea.hbm %s1802_s5, 256 }
 0x1c1   : > { %p1271_p4 = scmp.ne.s32.totalorder %s825_s18, %s1270_s21  ;;  %p1275_p9 = scmp.lt.s32.totalorder %s825_s18, %s1802_s5 }
 0x1c2   : > { %p1276_p10 = scmp.lt.s32.totalorder %s1274_s17, %s1270_s21 }
 0x1c3   : > { %p1272_p7 = pnand %p1271_p4, %p1495_p5 }
 0x1c4   : > { %p1277_p11 = por %p1276_p10, %p1275_p9 }
 0x1c5   : > { %p1273_p8 = pneg %p1272_p7 }
 0x1c7   : > { %p1278_p12 = pnand %p1277_p11, %p1273_p8 }
 0x1c9   : > { %1281 = shalt.err (!%p1278_p12)
}
 0x1ca   : > { %1192 = dma.vmem_to_hbm [thread:$0]  (%p1495_p5), %s828_s19, 64, %s825_s18, %s801_s22   ;;  %vm714_vm4 = vcmask 57344  }
 0x1cb   : > { %s1809_s10 = sshll.u32 %s1476_s9, 4  ;;  %s322_s23 = scalar_lea.vmem [#allocation7], %s1540_s20 }
 0x1cc   : > { %s866_s24 = sshll.u32 %s322_s23, 4  ;;  %s316_s0 = scalar_lea.vmem [#allocation6], %s1540_s20  ;;  %s1685_s24 = int_to_ptr.vmem [resolvable:$true] %s866_s24 }
 0x1cd   : > { %s1683_s25 = scalar_lea.hbm %s1805_s8, %s1809_s10  ;;  %s815_s18 = scalar_lea.sflag [#allocation8], %s1540_s20 }
 0x1ce   : > { %s1282_s19 = scalar_lea.vmem %s1685_s24, 16  ;;  %s1407_s22 = smov [#allocation7]  }
 0x1cf   : > { %p1283_p13 = scmp.ne.s32.totalorder %s1685_s24, %s1282_s19  ;;  %s1286_s26 = sshll.u32 %s1407_s22, 4  ;;  %s1287_s26 = int_to_ptr.vmem [resolvable:$false] %s1286_s26 }
 0x1d0   : > { %s1288_s13 = scalar_lea.vmem %s1287_s26, 32  ;;  %p1289_p2 = scmp.lt.s32.totalorder %s1685_s24, %s1287_s26 }
 0x1d1   : > { %p1284_p0 = pnand %p1283_p13, %p1495_p5  ;;  %p1290_p3 = scmp.lt.s32.totalorder %s1288_s13, %s1282_s19 }
 0x1d3   : > { %p1285_p1 = pneg %p1284_p0  ;;  %p1291_p4 = por %p1290_p3, %p1289_p2 }
 0x1d5   : > { %p1292_p7 = pnand %p1291_p4, %p1285_p1 }
 0x26e   : > { %v569_v40 = vpop.f32.mrf.mxu1 }
 0x26f   : > { %715 = vst.msk [vmem:[%s316_s0] sm:$0x1] %vm714_vm4, %v569_v40 }
 0x270   : > { %v1139_v41 = vpop.f32.mrf.mxu1  ;;  %v710_v42 = vpop.f32.mrf.mxu0 }
 0x271   : > { %716 = vst.msk [vmem:[%s322_s23] sm:$0x1] %vm714_vm4, %v710_v42 }
 0x272   : > { %v1179_v43 = vpop.f32.mrf.mxu0 }
 0x273   : > { %1295 = shalt.err (!%p1292_p7)
}
 0x274   : > { %s1296_s17 = scalar_lea.hbm %s1683_s25, 16  ;;  %s1300_s12 = scalar_lea.hbm %s1805_s8, 64 }
 0x275   : > { %p1297_p8 = scmp.ne.s32.totalorder %s1683_s25, %s1296_s17  ;;  %p1301_p11 = scmp.lt.s32.totalorder %s1683_s25, %s1805_s8 }
 0x276   : > { %p1302_p12 = scmp.lt.s32.totalorder %s1300_s12, %s1296_s17 }
 0x277   : > { %p1298_p9 = pnand %p1297_p8, %p1495_p5 }
 0x278   : > { %p1303_p13 = por %p1302_p12, %p1301_p11 }
 0x279   : > { %p1299_p10 = pneg %p1298_p9 }
 0x27b   : > { %p1304_p0 = pnand %p1303_p13, %p1299_p10 }
 0x27d   : > { %1307 = shalt.err (!%p1304_p0)
}
 0x27e   : > { %1195 = dma.vmem_to_hbm [thread:$0]  (%p1495_p5), %s1685_s24, 16, %s1683_s25, %s815_s18   ;;  %v1026_v44 = vld [vmem:[%s1800_s3] ss:$0 sm:$0xff]  ;;  %v792_v45 = vpop.f32.mrf.mxu1 }
 0x27f   : > { %s805_s10 = sand.u32 1, %s1476_s9   ;;  %s1816_s13 = sshll.u32 %s1540_s20, 2  ;;  %v793_v46 = vadd.f32 %v1026_v44, %v792_v45 }
 0x280   : > { %s310_s17 = scalar_lea.vmem [#allocation4], %s1816_s13  ;;  %s853_s21 = sshll.u32 %s316_s0, 4  ;;  %v1190_v47 = vpop.f32.mrf.mxu1  ;;  %s1725_s21 = int_to_ptr.vmem [resolvable:$true] %s853_s21 }
 0x281   : > { %s840_s23 = sshll.u32 %s310_s17, 4  ;;  %v798_v48 = vpack.c.bf16 %v793_v46, %v793_v46  ;;  %s1817_s12 = sshll.u32 %s1476_s9, 6  ;;  %s1723_s23 = int_to_ptr.vmem [resolvable:$true] %s840_s23 }
 0x282   : > { %s1721_s24 = scalar_lea.hbm %s1803_s6, %s1817_s12  ;;  %v795_v49 = vpop.f32.mrf.mxu1  ;;  %s1818_s25 = sshll.u32 %s1476_s9, 4 }
 0x283   : > { %s1732_s18 = scalar_lea.hbm %s1804_s7, %s1818_s25  ;;  %799 = vst [vmem:[%s310_s17] sm:$0xf] %v798_v48  ;;  %s1734_s19 = scalar_lea.sflag [#allocation5], %s805_s10 }
 0x284   : > { %v1191_v50 = vpop.f32.mrf.mxu1  ;;  %s1308_s1 = scalar_lea.vmem %s1723_s23, 64  ;;  %s1408_s26 = smov [#allocation4]  }
 0x285   : > { %p1309_p1 = scmp.ne.s32.totalorder %s1723_s23, %s1308_s1  ;;  %s1312_s13 = sshll.u32 %s1408_s26, 4  ;;  %s1313_s13 = int_to_ptr.vmem [resolvable:$false] %s1312_s13 }
 0x286   : > { %s1314_s12 = scalar_lea.vmem %s1313_s13, 128  ;;  %p1315_p4 = scmp.lt.s32.totalorder %s1723_s23, %s1313_s13 }
 0x287   : > { %p1310_p2 = pnand %p1309_p1, %p1495_p5  ;;  %p1316_p7 = scmp.lt.s32.totalorder %s1314_s12, %s1308_s1 }
 0x289   : > { %p1311_p3 = pneg %p1310_p2  ;;  %p1317_p8 = por %p1316_p7, %p1315_p4 }
 0x28b   : > { %p1318_p9 = pnand %p1317_p8, %p1311_p3 }
 0x28d   : > { %1321 = shalt.err (!%p1318_p9)
}
 0x28e   : > { %s1322_s9 = scalar_lea.hbm %s1721_s24, 64  ;;  %s1326_s22 = scalar_lea.hbm %s1803_s6, 256 }
 0x28f   : > { %p1323_p10 = scmp.ne.s32.totalorder %s1721_s24, %s1322_s9  ;;  %p1327_p13 = scmp.lt.s32.totalorder %s1721_s24, %s1803_s6 }
 0x290   : > { %p1328_p0 = scmp.lt.s32.totalorder %s1326_s22, %s1322_s9 }
 0x291   : > { %p1324_p11 = pnand %p1323_p10, %p1495_p5 }
 0x292   : > { %p1329_p1 = por %p1328_p0, %p1327_p13 }
 0x293   : > { %p1325_p12 = pneg %p1324_p11 }
 0x295   : > { %p1330_p2 = pnand %p1329_p1, %p1325_p12 }
 0x297   : > { %1333 = shalt.err (!%p1330_p2)
}
 0x298   : > { %1193 = dma.vmem_to_hbm [thread:$0]  (%p1495_p5), %s1723_s23, 64, %s1721_s24, %s1734_s19  }
 0x299   : > { %s1334_s0 = scalar_lea.vmem %s1725_s21, 16  ;;  %s1409_s1 = smov [#allocation6]  }
 0x29a   : > { %p1335_p3 = scmp.ne.s32.totalorder %s1725_s21, %s1334_s0  ;;  %s1338_s26 = sshll.u32 %s1409_s1, 4  ;;  %s1339_s26 = int_to_ptr.vmem [resolvable:$false] %s1338_s26 }
 0x29b   : > { %s1340_s13 = scalar_lea.vmem %s1339_s26, 32  ;;  %p1341_p8 = scmp.lt.s32.totalorder %s1725_s21, %s1339_s26 }
 0x29c   : > { %p1336_p4 = pnand %p1335_p3, %p1495_p5  ;;  %p1342_p9 = scmp.lt.s32.totalorder %s1340_s13, %s1334_s0 }
 0x29e   : > { %p1337_p7 = pneg %p1336_p4  ;;  %p1343_p10 = por %p1342_p9, %p1341_p8 }
 0x2a0   : > { %p1344_p11 = pnand %p1343_p10, %p1337_p7 }
 0x2a2   : > { %1347 = shalt.err (!%p1344_p11)
}
 0x2a3   : > { %s1348_s12 = scalar_lea.hbm %s1732_s18, 16  ;;  %s1352_s9 = scalar_lea.hbm %s1804_s7, 64 }
 0x2a4   : > { %p1349_p12 = scmp.ne.s32.totalorder %s1732_s18, %s1348_s12  ;;  %p1353_p1 = scmp.lt.s32.totalorder %s1732_s18, %s1804_s7 }
 0x2a5   : > { %p1354_p2 = scmp.lt.s32.totalorder %s1352_s9, %s1348_s12 }
 0x2a6   : > { %p1350_p13 = pnand %p1349_p12, %p1495_p5 }
 0x2a7   : > { %p1355_p3 = por %p1354_p2, %p1353_p1 }
 0x2a8   : > { %p1351_p0 = pneg %p1350_p13 }
 0x2aa   : > { %p1356_p4 = pnand %p1355_p3, %p1351_p0 }
 0x2ac   : > { %1359 = shalt.err (!%p1356_p4)
}
 0x2ad   : > { %1194 = dma.vmem_to_hbm [thread:$0]  (%p1495_p5), %s1725_s21, 16, %s1732_s18, %s1734_s19  }
 0x2ae PF: > { %p1213_p7 = scmp.ge.s32.totalorder %s1402_s30, 2  ;;  %s878_s22 = sand.u32 1, %s1390_s27  }
 0x2af   : > { %s879_s25 = scalar_lea.sflag [#allocation3], %s878_s22 }
 0x2b0   : > { %p1201_p8 = pnand %p1213_p7, %p1499_p6 }
 0x2b2   : > { %p1202_p9 = pneg %p1201_p8 }
 0x2b4   : > { %1377 = dma.done.wait (%p1202_p9), %s879_s25, 64  }
 0x2b5   : > { %1379 = vsyncadd (%p1202_p9), %s879_s25, 4294967232  ;;  %s1819_s20 = sadd.s32 4294967294, %s1402_s30  }
 0x2b6   : > { %s887_s0 = sand.u32 1, %s1819_s20  }
 0x2b7   : > { %s888_s15 = scalar_lea.sflag [#allocation5], %s887_s0 }
 0x2b8   : > { %1381 = dma.done.wait (%p1202_p9), %s888_s15, 80  }
 0x2b9   : > { %1383 = vsyncadd (%p1202_p9), %s888_s15, 4294967216  ;;  %s905_s1 = scalar_lea.sflag [#allocation8], %s878_s22 }
 0x2ba   : > { %1385 = dma.done.wait (%p1202_p9), %s905_s1, 16  }
 0x2bb   : > { %1387 = vsyncadd (%p1202_p9), %s905_s1, 4294967280  ;;  %p25_p5 = scmp.ge.s32.totalorder %s1480_s11, 6   ;;  %s1820_s27 = smov %s1394_s28 }
 0x2bc   : > { %s1821_s28 = smov %s1398_s29  ;;  %s1822_s29 = smov %s1493_s14 }
 0x2bd   : > { %s1823_s30 = smov %s1480_s11  ;;  %27 = sbr.rel (!%p25_p5) target bundleno = 10 (0xa), region = 124 }
 0x2c2   :  { %909 = vsyncpa [#allocation3], 1 }
 0x2c3   :  { %911 = vsyncpa [#allocation3 + $0x1], 1 }
 0x2c4   :  { %912 = vsyncpa [#allocation5], 1 }
 0x2c5   :  { %914 = vsyncpa [#allocation5 + $0x1], 1 }
 0x2c6   :  { %915 = vsyncpa [#allocation8], 1 }
 0x2c7   :  { %917 = vsyncpa [#allocation8 + $0x1], 1 }

</bundles_post_ra>
